<compile_context>
chip_gen: v7x
topology: tpu7x:2x2x1
jax: 0.10.0
libtpu: 0.0.40
codegen_flags: <defaults>
</compile_context>

<pallas_src>
import functools

import jax
import jax.numpy as jnp
from jax.experimental import pallas as pl
from jax.experimental.pallas import tpu as pltpu


def im2col_conv_bn_relu_kernel(x_ref, w_ref, scale_ref, bias_ref, o_ref):
    """Fused (im2col'd) 3x3 conv + folded BatchNorm + ReLU: one MXU matmul + VPU epilogue.

    x_ref:     (tile_m, 9*Cin)  im2col'd activation rows (built in the wrapper with XLA)
    w_ref:     (9*Cin, Cout)    conv weights flattened along K (tap-major, then Cin)
    scale_ref: (1, Cout)        folded BN scale = gamma / sqrt(var + eps)
    bias_ref:  (1, Cout)        folded BN bias  = (conv_bias - mean) * scale + beta
    o_ref:     (tile_m, Cout)
    """
    acc = jnp.dot(x_ref[...], w_ref[...], preferred_element_type=jnp.float32)
    y = acc * scale_ref[...] + bias_ref[...]          # broadcast (1, Cout), f32 epilogue
    o_ref[...] = jnp.maximum(y, 0.0).astype(o_ref.dtype)


def shared_conv_pallas(x_nchw, w_hwio, bn_scale, bn_bias, *, tile_m=256):
    """NCHW input -> im2col (XLA) -> single fused Pallas matmul kernel -> NCHW output."""
    B, Cin, H, W = x_nchw.shape
    Cout = w_hwio.shape[3]
    K = 9 * Cin

    # ---- XLA glue: NHWC, zero-pad, im2col with tap-major K (matches w_hwio.reshape) ----
    x_nhwc = jnp.transpose(x_nchw, (0, 2, 3, 1)).astype(jnp.float32)
    x_pad = jnp.pad(x_nhwc, ((0, 0), (1, 1), (1, 1), (0, 0)))        # conv padding = 1
    taps = [x_pad[:, dy:dy + H, dx:dx + W, :] for dy in range(3) for dx in range(3)]
    x_cols = jnp.stack(taps, axis=3).reshape(B * H * W, K)           # (M, 9*Cin), lane-dense K

    # Weight (3,3,Cin,Cout) flattens row-major to K index = (dy*3+dx)*Cin + cin -> matches taps.
    w2d = w_hwio.reshape(K, Cout).astype(jnp.float32)
    scale2d = bn_scale.reshape(1, Cout).astype(jnp.float32)
    bias2d = bn_bias.reshape(1, Cout).astype(jnp.float32)

    # ---- M tiling: batch folded into M; >=2 parallel grid steps when M allows ----
    M = B * H * W
    tile_m = min(tile_m, M)
    tile_m = max(8, (tile_m // 8) * 8)                # sublane-aligned tile
    M_pad = pl.cdiv(M, tile_m) * tile_m
    if M_pad != M:
        x_cols = jnp.pad(x_cols, ((0, M_pad - M), (0, 0)))
    grid_m = M_pad // tile_m

    out2d = pl.pallas_call(
        im2col_conv_bn_relu_kernel,
        out_shape=jax.ShapeDtypeStruct((M_pad, Cout), jnp.float32),
        grid_spec=pltpu.PrefetchScalarGridSpec(
            num_scalar_prefetch=0,
            grid=(grid_m,),
            in_specs=[
                pl.BlockSpec((tile_m, K), lambda i: (i, 0)),
                pl.BlockSpec((K, Cout), lambda i: (0, 0)),
                pl.BlockSpec((1, Cout), lambda i: (0, 0)),
                pl.BlockSpec((1, Cout), lambda i: (0, 0)),
            ],
            out_specs=pl.BlockSpec((tile_m, Cout), lambda i: (i, 0)),
        ),
        compiler_params=pltpu.CompilerParams(
            dimension_semantics=("parallel",),        # M tiles shard across v7x's 2 TCs
        ),
    )(x_cols, w2d, scale2d, bias2d)

    # Reshape/transpose back are XLA glue; module semantics are NCHW (PyTorch convention).
    out_nhwc = out2d[:M].reshape(B, H, W, Cout)
    return jnp.transpose(out_nhwc, (0, 3, 1, 2))


def e2e_refinement_head_forward(x_nchw, params):
    """Forward pass of E2ERefinementHead (inference path).

    spatial_features_2d = shared_conv(x)  [Pallas kernel]
    final_feat = cat(task final_feats + [spatial_features_2d], dim=1)
    """
    spatial_features_2d = shared_conv_pallas(
        x_nchw, params["w_hwio"], params["bn_scale"], params["bn_bias"])

    # TODO(synk): OneNetRefineHead task heads (and matcher/loss/NMS post-processing) are
    # external modules not defined in the reference file; with zero tasks, final_feat
    # reduces to the shared-conv features.
    task_final_feats = []
    final_feat = jnp.concatenate(task_final_feats + [spatial_features_2d], axis=1)

    return {"spatial_features_2d": spatial_features_2d, "final_feat": final_feat}


def _make_params(key, in_channels, shared_ch):
    """Deterministic synthetic parameters for shared_conv (Conv2d + BatchNorm2d)."""
    k_w, k_b, k_g, k_be, k_m, k_v = jax.random.split(key, 6)
    # PyTorch Conv2d weight layout is (Cout, Cin, kH, kW); convert to HWIO for the kernel.
    w_oihw = 0.1 * jax.random.normal(k_w, (shared_ch, in_channels, 3, 3), dtype=jnp.float32)
    conv_bias = 0.1 * jax.random.normal(k_b, (shared_ch,), dtype=jnp.float32)
    gamma = 1.0 + 0.1 * jax.random.normal(k_g, (shared_ch,), dtype=jnp.float32)
    beta = 0.1 * jax.random.normal(k_be, (shared_ch,), dtype=jnp.float32)
    running_mean = 0.1 * jax.random.normal(k_m, (shared_ch,), dtype=jnp.float32)
    running_var = 1.0 + 0.1 * jax.random.uniform(k_v, (shared_ch,), dtype=jnp.float32)
    eps = 1e-5

    # Fold inference-mode BatchNorm (+ conv bias) into an affine applied after the matmul.
    bn_scale = gamma / jnp.sqrt(running_var + eps)
    bn_bias = (conv_bias - running_mean) * bn_scale + beta

    return {
        "w_oihw": w_oihw,
        "w_hwio": jnp.transpose(w_oihw, (2, 3, 1, 0)),  # (3, 3, Cin, Cout)
        "conv_bias": conv_bias,
        "gamma": gamma,
        "beta": beta,
        "running_mean": running_mean,
        "running_var": running_var,
        "eps": eps,
        "bn_scale": bn_scale,
        "bn_bias": bn_bias,
    }


def _reference_forward(x_nchw, params):
    """Pure-JAX reference (lax conv) for correctness checking."""
    y = jax.lax.conv_general_dilated(
        x_nchw, params["w_oihw"], window_strides=(1, 1), padding="SAME",
        dimension_numbers=("NCHW", "OIHW", "NCHW"))
    y = y + params["conv_bias"][None, :, None, None]
    inv_std = 1.0 / jnp.sqrt(params["running_var"] + params["eps"])
    y = (y - params["running_mean"][None, :, None, None]) * \
        (params["gamma"] * inv_std)[None, :, None, None] + params["beta"][None, :, None, None]
    return jnp.maximum(y, 0.0)


if __name__ == "__main__":
    B, Cin, H, W = 2, 4, 16, 16   # spatial_features_2d: NCHW, like the PyTorch module input
    shared_ch = 32                # model_cfg.PARAMETERS.shared_ch

    key = jax.random.PRNGKey(0)
    k_x, k_p = jax.random.split(key)
    x = jax.random.normal(k_x, (B, Cin, H, W), dtype=jnp.float32)
    params = _make_params(k_p, Cin, shared_ch)

    out = e2e_refinement_head_forward(x, params)
    jax.block_until_ready(out)

    ref = _reference_forward(x, params)
    assert out["spatial_features_2d"].shape == (B, shared_ch, H, W)
    assert out["final_feat"].shape == (B, shared_ch, H, W)
    assert jnp.allclose(out["spatial_features_2d"], ref, atol=1e-3, rtol=1e-3)

    print("KERNEL_OK")
</pallas_src>

<mosaic_0001>
module attributes {stable_mosaic.version = 11 : i64} {
  func.func @im2col_conv_bn_relu_kernel(%arg0: i32, %arg1: memref<256x36xf32, #tpu.memory_space<vmem>>, %arg2: memref<36x32xf32, #tpu.memory_space<vmem>>, %arg3: memref<1x32xf32, #tpu.memory_space<vmem>>, %arg4: memref<1x32xf32, #tpu.memory_space<vmem>>, %arg5: memref<256x32xf32, #tpu.memory_space<vmem>>) attributes {dimension_semantics = [#tpu.dimension_semantics<parallel>], iteration_bounds = array<i64: 2>, scalar_prefetch = 0 : i64, scratch_operands = 0 : i64, tpu.core_type = #tpu.core_type<tc>, window_params = [{transform_indices = @transform_0, window_bounds = array<i64: 256, 36>}, {pipeline_mode = #tpu.pipeline_mode<synchronous>, transform_indices = @transform_1, window_bounds = array<i64: 36, 32>}, {pipeline_mode = #tpu.pipeline_mode<synchronous>, transform_indices = @transform_2, window_bounds = array<i64: 1, 32>}, {pipeline_mode = #tpu.pipeline_mode<synchronous>, transform_indices = @transform_3, window_bounds = array<i64: 1, 32>}, {transform_indices = @transform_4, window_bounds = array<i64: 256, 32>}]} {
    %c0 = arith.constant 0 : index
    %c0_0 = arith.constant 0 : index
    %0 = vector.load %arg1[%c0, %c0_0] : memref<256x36xf32, #tpu.memory_space<vmem>>, vector<256x36xf32>
    %c0_1 = arith.constant 0 : index
    %c0_2 = arith.constant 0 : index
    %1 = vector.load %arg2[%c0_1, %c0_2] : memref<36x32xf32, #tpu.memory_space<vmem>>, vector<36x32xf32>
    %cst = arith.constant dense<0.000000e+00> : vector<256x32xf32>
    %2 = tpu.matmul %0, %1, %cst {dimension_numbers = #tpu.dot_dimension_numbers<[1], [0], [0], [1], [0, 0, 1, 1], [], []>} : vector<256x36xf32>, vector<36x32xf32>, vector<256x32xf32> -> vector<256x32xf32>
    %c0_3 = arith.constant 0 : index
    %c0_4 = arith.constant 0 : index
    %3 = vector.load %arg3[%c0_3, %c0_4] : memref<1x32xf32, #tpu.memory_space<vmem>>, vector<1x32xf32>
    %4 = vector.broadcast %3 : vector<1x32xf32> to vector<256x32xf32>
    %5 = arith.mulf %2, %4 : vector<256x32xf32>
    %c0_5 = arith.constant 0 : index
    %c0_6 = arith.constant 0 : index
    %6 = vector.load %arg4[%c0_5, %c0_6] : memref<1x32xf32, #tpu.memory_space<vmem>>, vector<1x32xf32>
    %7 = vector.broadcast %6 : vector<1x32xf32> to vector<256x32xf32>
    %8 = arith.addf %5, %7 : vector<256x32xf32>
    %cst_7 = arith.constant 0.000000e+00 : f32
    %9 = vector.broadcast %cst_7 : f32 to vector<256x32xf32>
    %10 = arith.maximumf %8, %9 : vector<256x32xf32>
    %c0_8 = arith.constant 0 : index
    %c0_9 = arith.constant 0 : index
    %11 = vector.load %arg5[%c0_8, %c0_9] : memref<256x32xf32, #tpu.memory_space<vmem>>, vector<256x32xf32>
    tpu.vector_store %arg5[%c0_8, %c0_9], %10 {strides = array<i32>} : memref<256x32xf32, #tpu.memory_space<vmem>>, vector<256x32xf32>,
    return
  }
  func.func @transform_0(%arg0: i32) -> (i32, i32) {
    %c0_i32 = arith.constant 0 : i32
    %c0_i32_0 = arith.constant 0 : i32
    return %arg0, %c0_i32 : i32, i32
  }
  func.func @transform_1(%arg0: i32) -> (i32, i32) {
    %c0_i32 = arith.constant 0 : i32
    %c0_i32_0 = arith.constant 0 : i32
    %c0_i32_1 = arith.constant 0 : i32
    return %c0_i32, %c0_i32_0 : i32, i32
  }
  func.func @transform_2(%arg0: i32) -> (i32, i32) {
    %c0_i32 = arith.constant 0 : i32
    %c0_i32_0 = arith.constant 0 : i32
    %c0_i32_1 = arith.constant 0 : i32
    return %c0_i32, %c0_i32_0 : i32, i32
  }
  func.func @transform_3(%arg0: i32) -> (i32, i32) {
    %c0_i32 = arith.constant 0 : i32
    %c0_i32_0 = arith.constant 0 : i32
    %c0_i32_1 = arith.constant 0 : i32
    return %c0_i32, %c0_i32_0 : i32, i32
  }
  func.func @transform_4(%arg0: i32) -> (i32, i32) {
    %c0_i32 = arith.constant 0 : i32
    %c0_i32_0 = arith.constant 0 : i32
    return %arg0, %c0_i32 : i32, i32
  }
}

</mosaic_0001>

<bundles_post_ra>
// kernel: tpu_custom_call.1
= control target key start
LH: loop header
LB: loop body
LE: loop exit
PB: predicated region body
PF: predicated region fallthrough
CT: control target
= control target key end

     0   :  { %s959_s15 = smov 0   ;;  %s1208_s0 = inlined_call_operand.vmem [shape: f32[512,36], index: 0, kind: input, shape index: {}]   ;;  %s1209_s1 = inlined_call_operand.vmem [shape: f32[36,32], index: 1, kind: input, shape index: {}]   ;;  %s1210_s2 = inlined_call_operand.vmem [shape: f32[1,32], index: 2, kind: input, shape index: {}]   ;;  %s1211_s3 = inlined_call_operand.vmem [shape: f32[1,32], index: 3, kind: input, shape index: {}]   ;;  %s1212_s4 = inlined_call_operand.vmem [shape: f32[512,32], index: 4, kind: output, shape index: {}]  }
   0x1 LB: > { %s763_s16 = sadd.s32 4294967295, %s932_s15   ;;  %p767_p0 = scmp.ge.s32.totalorder %s932_s15, 1  ;;  %s932_s15 = sphi %s959_s15, %s14_s15  }
   0x2   : > { %p163_p1 = scmp.lt.s32.totalorder %s932_s15, 3 }
   0x4   : > { %p164_p2 = pnand %p767_p0, %p163_p1 }
   0x5   : > { %v233_v0 = vld [vmem:[%s1209_s1] sm:$0xff] (!%p164_p2)  ;;  %v234_v1 = vld [vmem:[%s1209_s1 + $0x8] sm:$0xff] (!%p164_p2)  ;;  %v235_v2 = vld [vmem:[%s1209_s1 + $0x10] sm:$0xff] (!%p164_p2)  ;;  %s768_s23 = sshll.u32 (!%p164_p2), %s763_s16, 5  ;;  %vm335_vm0 = vcmask (!%p164_p2), 1043456   ;;  %vm238_vm1 = vcmask (!%p164_p2), 293888  }
   0x6   : > { %167 = sbr.rel (%p164_p2) target bundleno = 267 (0x10b), region = 36  ;;  %v904_v3 = vpack.c.bf16 (!%p164_p2), %v234_v1, %v233_v0  ;;  %v236_v4 = vld [vmem:[%s1209_s1 + $0x18] sm:$0xff] (!%p164_p2)  ;;  %p190_p3 = scmp.lt.s32.totalorder (!%p164_p2), %s768_s23, 63  ;;  %v237_v6 = vld [vmem:[%s1209_s1 + $0x20] sm:$0xf] (!%p164_p2)  ;;  %vm674_vm2 = vcmask (!%p164_p2), 261120  }
   0x7   : > { %v908_v5 = vpack.c.bf16 (!%p164_p2), %v236_v4, %v235_v2  ;;  %v1063_v39 = vld [vmem:[%s1210_s2] ss:$0 sm:$0xff] (!%p164_p2) }
   0x8   : > { %905 = vmatprep.subr.bf16.mxu0 (!%p164_p2), %v904_v3  ;;  %912 = vmatprep.subr.bf16.mxu1 (!%p164_p2), %v904_v3  ;;  %v1068_v41 = vld [vmem:[%s1211_s3] ss:$0 sm:$0xff] (!%p164_p2) }
   0x9   : > { %907 = vmatpush3.bf16.msra.mxu0 (!%p164_p2), %v904_v3  ;;  %915 = vmatpush3.bf16.msra.mxu1 (!%p164_p2), %v904_v3 }
   0xa   : > { %909 = vmatprep.subr.bf16.mxu0 (!%p164_p2), %v908_v5  ;;  %913 = vmatprep.subr.bf16.mxu1 (!%p164_p2), %v908_v5 }
   0xd   : > { %s1214_s23 = smov (!%p190_p3, %s768_s23), 63  ;;  %911 = vmatpush3.bf16.msra.mxu0 %v908_v5  ;;  %916 = vmatpush3.bf16.msra.mxu1 %v908_v5 }
   0xe   : > { %s769_s26 = sshll.u32 %s1214_s23, 3  ;;  %854 = vmatprep.subr.msk.mxu0 %vm335_vm0, %v237_v6  ;;  %914 = vmatprep.subr.msk.mxu1 %vm335_vm0, %v237_v6 }
   0xf   : > { %s990_s5 = scalar_lea.vmem %s1208_s0, %s769_s26  ;;  %s1081_s12 = scalar_lea.vmem %s1212_s4, %s769_s26 }
  0x10   : > { %v201_v7 = vld [vmem:[%s990_s5] sm:$0xff]  ;;  %v202_v9 = vld [vmem:[%s990_s5 + $0x8] sm:$0xff]  ;;  %v203_v11 = vld [vmem:[%s990_s5 + $0x10] sm:$0xff] }
  0x11   : > { %v217_v8 = vld [vmem:[%s990_s5 + $0x80] sm:$0xff]  ;;  %856 = vmatprep.mubr.msk.f32.mxu0 %vm238_vm1, %v201_v7  ;;  %v218_v10 = vld [vmem:[%s990_s5 + $0x88] sm:$0xff]  ;;  %v219_v12 = vld [vmem:[%s990_s5 + $0x90] sm:$0xff]  ;;  %855 = vmatpush3.msk.msra.mxu0 %vm335_vm0, %v237_v6 }
  0x12   : > { %880 = vmatprep.mubr.msk.f32.mxu1 %vm238_vm1, %v217_v8  ;;  %917 = vmatpush3.msk.msra.mxu1 %vm335_vm0, %v237_v6  ;;  %v204_v13 = vld [vmem:[%s990_s5 + $0x18] sm:$0xff]  ;;  %v205_v15 = vld [vmem:[%s990_s5 + $0x20] sm:$0xff]  ;;  %v206_v17 = vld [vmem:[%s990_s5 + $0x28] sm:$0xff] }
  0x13   : > { %857 = vmatmul.mubr.msk.f32.vlgmr.msra.gmra.mrb[0].mxu0 %vm238_vm1, %v202_v9  ;;  %881 = vmatmul.mubr.msk.f32.vlgmr.msra.gmra.mrb[0].mxu1 %vm238_vm1, %v218_v10  ;;  %v220_v14 = vld [vmem:[%s990_s5 + $0x98] sm:$0xff]  ;;  %v221_v16 = vld [vmem:[%s990_s5 + $0xa0] sm:$0xff]  ;;  %v222_v18 = vld [vmem:[%s990_s5 + $0xa8] sm:$0xff] }
  0x14   : > { %859 = vmatprep.mubr.msk.f32.mxu0 %vm238_vm1, %v203_v11  ;;  %883 = vmatprep.mubr.msk.f32.mxu1 %vm238_vm1, %v219_v12  ;;  %v207_v19 = vld [vmem:[%s990_s5 + $0x30] sm:$0xff]  ;;  %v208_v21 = vld [vmem:[%s990_s5 + $0x38] sm:$0xff]  ;;  %v209_v23 = vld [vmem:[%s990_s5 + $0x40] sm:$0xff] }
  0x15   : > { %v223_v20 = vld [vmem:[%s990_s5 + $0xb0] sm:$0xff]  ;;  %v224_v22 = vld [vmem:[%s990_s5 + $0xb8] sm:$0xff]  ;;  %v225_v24 = vld [vmem:[%s990_s5 + $0xc0] sm:$0xff] }
  0x16   : > { %v210_v25 = vld [vmem:[%s990_s5 + $0x48] sm:$0xff]  ;;  %v211_v27 = vld [vmem:[%s990_s5 + $0x50] sm:$0xff]  ;;  %v212_v29 = vld [vmem:[%s990_s5 + $0x58] sm:$0xff] }
  0x17   : > { %860 = vmatmul.mubr.msk.f32.gmra.mrb[2].mxu0 %vm238_vm1, %v204_v13  ;;  %884 = vmatmul.mubr.msk.f32.gmra.mrb[2].mxu1 %vm238_vm1, %v220_v14  ;;  %v226_v26 = vld [vmem:[%s990_s5 + $0xc8] sm:$0xff]  ;;  %v227_v28 = vld [vmem:[%s990_s5 + $0xd0] sm:$0xff]  ;;  %v228_v30 = vld [vmem:[%s990_s5 + $0xd8] sm:$0xff] }
  0x18   : > { %862 = vmatprep.mubr.msk.f32.mxu0 %vm238_vm1, %v205_v15  ;;  %886 = vmatprep.mubr.msk.f32.mxu1 %vm238_vm1, %v221_v16  ;;  %v213_v31 = vld [vmem:[%s990_s5 + $0x60] sm:$0xff]  ;;  %v214_v33 = vld [vmem:[%s990_s5 + $0x68] sm:$0xff]  ;;  %v215_v35 = vld [vmem:[%s990_s5 + $0x70] sm:$0xff] }
  0x19   : > { %v229_v32 = vld [vmem:[%s990_s5 + $0xe0] sm:$0xff]  ;;  %v230_v34 = vld [vmem:[%s990_s5 + $0xe8] sm:$0xff]  ;;  %v231_v36 = vld [vmem:[%s990_s5 + $0xf0] sm:$0xff] }
  0x1a   : > { %v216_v37 = vld [vmem:[%s990_s5 + $0x78] sm:$0xff] }
  0x1b   : > { %863 = vmatmul.mubr.msk.f32.gmra.mrb[4].mxu0 %vm238_vm1, %v206_v17  ;;  %887 = vmatmul.mubr.msk.f32.gmra.mrb[4].mxu1 %vm238_vm1, %v222_v18  ;;  %v232_v38 = vld [vmem:[%s990_s5 + $0xf8] sm:$0xff] }
  0x1c   : > { %865 = vmatprep.mubr.msk.f32.mxu0 %vm238_vm1, %v207_v19  ;;  %889 = vmatprep.mubr.msk.f32.mxu1 %vm238_vm1, %v223_v20 }
  0x1f   : > { %866 = vmatmul.mubr.msk.f32.gmra.mrb[6].mxu0 %vm238_vm1, %v208_v21  ;;  %890 = vmatmul.mubr.msk.f32.gmra.mrb[6].mxu1 %vm238_vm1, %v224_v22 }
  0x20   : > { %868 = vmatprep.mubr.msk.f32.mxu0 %vm238_vm1, %v209_v23  ;;  %892 = vmatprep.mubr.msk.f32.mxu1 %vm238_vm1, %v225_v24 }
  0x23   : > { %869 = vmatmul.mubr.msk.f32.gmra.mrb[8].mxu0 %vm238_vm1, %v210_v25  ;;  %893 = vmatmul.mubr.msk.f32.gmra.mrb[8].mxu1 %vm238_vm1, %v226_v26 }
  0x24   : > { %871 = vmatprep.mubr.msk.f32.mxu0 %vm238_vm1, %v211_v27  ;;  %895 = vmatprep.mubr.msk.f32.mxu1 %vm238_vm1, %v227_v28 }
  0x27   : > { %872 = vmatmul.mubr.msk.f32.gmra.mrb[10].mxu0 %vm238_vm1, %v212_v29  ;;  %896 = vmatmul.mubr.msk.f32.gmra.mrb[10].mxu1 %vm238_vm1, %v228_v30 }
  0x28   : > { %874 = vmatprep.mubr.msk.f32.mxu0 %vm238_vm1, %v213_v31  ;;  %898 = vmatprep.mubr.msk.f32.mxu1 %vm238_vm1, %v229_v32 }
  0x2b   : > { %875 = vmatmul.mubr.msk.f32.gmra.mrb[12].mxu0 %vm238_vm1, %v214_v33  ;;  %899 = vmatmul.mubr.msk.f32.gmra.mrb[12].mxu1 %vm238_vm1, %v230_v34 }
  0x2c   : > { %877 = vmatprep.mubr.msk.f32.mxu0 %vm238_vm1, %v215_v35  ;;  %901 = vmatprep.mubr.msk.f32.mxu1 %vm238_vm1, %v231_v36 }
  0x2f   : > { %878 = vmatmul.mubr.msk.f32.gmra.mrb[14].mxu0 %vm238_vm1, %v216_v37  ;;  %902 = vmatmul.mubr.msk.f32.gmra.mrb[14].mxu1 %vm238_vm1, %v232_v38 }
  0xe6   : > { %v858_v40 = vpop.f32.mrb[0].mxu0  ;;  %v882_v42 = vpop.f32.mrb[0].mxu1 }
  0xe7   : > { %v572_v43 = vmul.f32 %v858_v40, %v1063_v39  ;;  %v588_v44 = vmul.f32 %v882_v42, %v1063_v39  ;;  %v405_v45 = vpop.f32.mrb[1].mxu0  ;;  %v485_v46 = vpop.f32.mrb[1].mxu1 }
  0xe8   : > { %v571_v47 = vmul.f32 %v1063_v39, %v405_v45  ;;  %v587_v48 = vmul.f32 %v1063_v39, %v485_v46 }
  0xe9   : > { %v611_v49 = vadd.f32 %v1068_v41, %v572_v43  ;;  %v627_v50 = vadd.f32 %v1068_v41, %v588_v44 }
  0xea   : > { %v610_v51 = vadd.f32 %v1068_v41, %v571_v47  ;;  %v626_v52 = vadd.f32 %v1068_v41, %v587_v48  ;;  %v861_v53 = vpop.f32.mrb[2].mxu0  ;;  %v885_v54 = vpop.f32.mrb[2].mxu1 }
  0xeb   : > { %v643_v55 = vmax.f32 %v611_v49, 0.0  ;;  %v659_v56 = vmax.f32 %v627_v50, 0.0  ;;  %v574_v57 = vmul.f32 %v861_v53, %v1063_v39  ;;  %v590_v58 = vmul.f32 %v885_v54, %v1063_v39  ;;  %v415_v59 = vpop.f32.mrb[3].mxu0  ;;  %v495_v60 = vpop.f32.mrb[3].mxu1 }
  0xec   : > { %v642_v61 = vmax.f32 %v610_v51, 0.0  ;;  %v658_v62 = vmax.f32 %v626_v52, 0.0  ;;  %v573_v63 = vmul.f32 %v1063_v39, %v415_v59  ;;  %v589_v0 = vmul.f32 %v1063_v39, %v495_v60 }
  0xed   : > { %676 = vst.msk [vmem:[%s1081_s12 + $0x8] sm:$0xff] %vm674_vm2, %v643_v55  ;;  %692 = vst.msk [vmem:[%s1081_s12 + $0x88] sm:$0xff] %vm674_vm2, %v659_v56  ;;  %v613_v1 = vadd.f32 %v1068_v41, %v574_v57  ;;  %v629_v2 = vadd.f32 %v1068_v41, %v590_v58 }
  0xee   : > { %675 = vst.msk [vmem:[%s1081_s12] sm:$0xff] %vm674_vm2, %v642_v61  ;;  %691 = vst.msk [vmem:[%s1081_s12 + $0x80] sm:$0xff] %vm674_vm2, %v658_v62  ;;  %v612_v3 = vadd.f32 %v1068_v41, %v573_v63  ;;  %v628_v4 = vadd.f32 %v1068_v41, %v589_v0  ;;  %v864_v5 = vpop.f32.mrb[4].mxu0  ;;  %v888_v6 = vpop.f32.mrb[4].mxu1 }
  0xef   : > { %v645_v7 = vmax.f32 %v613_v1, 0.0  ;;  %v661_v8 = vmax.f32 %v629_v2, 0.0  ;;  %v576_v9 = vmul.f32 %v864_v5, %v1063_v39  ;;  %v592_v10 = vmul.f32 %v888_v6, %v1063_v39  ;;  %v425_v11 = vpop.f32.mrb[5].mxu0  ;;  %v505_v12 = vpop.f32.mrb[5].mxu1 }
  0xf0   : > { %v644_v13 = vmax.f32 %v612_v3, 0.0  ;;  %v660_v14 = vmax.f32 %v628_v4, 0.0  ;;  %v575_v15 = vmul.f32 %v1063_v39, %v425_v11  ;;  %v591_v16 = vmul.f32 %v1063_v39, %v505_v12 }
  0xf1   : > { %678 = vst.msk [vmem:[%s1081_s12 + $0x18] sm:$0xff] %vm674_vm2, %v645_v7  ;;  %694 = vst.msk [vmem:[%s1081_s12 + $0x98] sm:$0xff] %vm674_vm2, %v661_v8  ;;  %v615_v17 = vadd.f32 %v1068_v41, %v576_v9  ;;  %v631_v18 = vadd.f32 %v1068_v41, %v592_v10 }
  0xf2   : > { %677 = vst.msk [vmem:[%s1081_s12 + $0x10] sm:$0xff] %vm674_vm2, %v644_v13  ;;  %693 = vst.msk [vmem:[%s1081_s12 + $0x90] sm:$0xff] %vm674_vm2, %v660_v14  ;;  %v614_v19 = vadd.f32 %v1068_v41, %v575_v15  ;;  %v630_v20 = vadd.f32 %v1068_v41, %v591_v16  ;;  %v867_v21 = vpop.f32.mrb[6].mxu0  ;;  %v891_v22 = vpop.f32.mrb[6].mxu1 }
  0xf3   : > { %v647_v23 = vmax.f32 %v615_v17, 0.0  ;;  %v663_v24 = vmax.f32 %v631_v18, 0.0  ;;  %v578_v25 = vmul.f32 %v867_v21, %v1063_v39  ;;  %v594_v26 = vmul.f32 %v891_v22, %v1063_v39  ;;  %v435_v27 = vpop.f32.mrb[7].mxu0  ;;  %v515_v28 = vpop.f32.mrb[7].mxu1 }
  0xf4   : > { %v646_v29 = vmax.f32 %v614_v19, 0.0  ;;  %v662_v30 = vmax.f32 %v630_v20, 0.0  ;;  %v577_v31 = vmul.f32 %v1063_v39, %v435_v27  ;;  %v593_v32 = vmul.f32 %v1063_v39, %v515_v28 }
  0xf5   : > { %680 = vst.msk [vmem:[%s1081_s12 + $0x28] sm:$0xff] %vm674_vm2, %v647_v23  ;;  %696 = vst.msk [vmem:[%s1081_s12 + $0xa8] sm:$0xff] %vm674_vm2, %v663_v24  ;;  %v617_v33 = vadd.f32 %v1068_v41, %v578_v25  ;;  %v633_v34 = vadd.f32 %v1068_v41, %v594_v26 }
  0xf6   : > { %679 = vst.msk [vmem:[%s1081_s12 + $0x20] sm:$0xff] %vm674_vm2, %v646_v29  ;;  %695 = vst.msk [vmem:[%s1081_s12 + $0xa0] sm:$0xff] %vm674_vm2, %v662_v30  ;;  %v616_v35 = vadd.f32 %v1068_v41, %v577_v31  ;;  %v632_v36 = vadd.f32 %v1068_v41, %v593_v32  ;;  %v870_v37 = vpop.f32.mrb[8].mxu0  ;;  %v894_v38 = vpop.f32.mrb[8].mxu1 }
  0xf7   : > { %v649_v40 = vmax.f32 %v617_v33, 0.0  ;;  %v665_v42 = vmax.f32 %v633_v34, 0.0  ;;  %v580_v43 = vmul.f32 %v870_v37, %v1063_v39  ;;  %v596_v44 = vmul.f32 %v894_v38, %v1063_v39  ;;  %v445_v45 = vpop.f32.mrb[9].mxu0  ;;  %v525_v46 = vpop.f32.mrb[9].mxu1 }
  0xf8   : > { %v648_v47 = vmax.f32 %v616_v35, 0.0  ;;  %v664_v48 = vmax.f32 %v632_v36, 0.0  ;;  %v579_v49 = vmul.f32 %v1063_v39, %v445_v45  ;;  %v595_v50 = vmul.f32 %v1063_v39, %v525_v46 }
  0xf9   : > { %682 = vst.msk [vmem:[%s1081_s12 + $0x38] sm:$0xff] %vm674_vm2, %v649_v40  ;;  %698 = vst.msk [vmem:[%s1081_s12 + $0xb8] sm:$0xff] %vm674_vm2, %v665_v42  ;;  %v619_v51 = vadd.f32 %v1068_v41, %v580_v43  ;;  %v635_v52 = vadd.f32 %v1068_v41, %v596_v44 }
  0xfa   : > { %681 = vst.msk [vmem:[%s1081_s12 + $0x30] sm:$0xff] %vm674_vm2, %v648_v47  ;;  %697 = vst.msk [vmem:[%s1081_s12 + $0xb0] sm:$0xff] %vm674_vm2, %v664_v48  ;;  %v618_v53 = vadd.f32 %v1068_v41, %v579_v49  ;;  %v634_v54 = vadd.f32 %v1068_v41, %v595_v50  ;;  %v873_v55 = vpop.f32.mrb[10].mxu0  ;;  %v897_v56 = vpop.f32.mrb[10].mxu1 }
  0xfb   : > { %v651_v57 = vmax.f32 %v619_v51, 0.0  ;;  %v667_v58 = vmax.f32 %v635_v52, 0.0  ;;  %v582_v59 = vmul.f32 %v873_v55, %v1063_v39  ;;  %v598_v60 = vmul.f32 %v897_v56, %v1063_v39  ;;  %v455_v61 = vpop.f32.mrb[11].mxu0  ;;  %v535_v62 = vpop.f32.mrb[11].mxu1 }
  0xfc   : > { %v650_v63 = vmax.f32 %v618_v53, 0.0  ;;  %v666_v0 = vmax.f32 %v634_v54, 0.0  ;;  %v581_v1 = vmul.f32 %v1063_v39, %v455_v61  ;;  %v597_v2 = vmul.f32 %v1063_v39, %v535_v62 }
  0xfd   : > { %684 = vst.msk [vmem:[%s1081_s12 + $0x48] sm:$0xff] %vm674_vm2, %v651_v57  ;;  %700 = vst.msk [vmem:[%s1081_s12 + $0xc8] sm:$0xff] %vm674_vm2, %v667_v58  ;;  %v621_v3 = vadd.f32 %v1068_v41, %v582_v59  ;;  %v637_v4 = vadd.f32 %v1068_v41, %v598_v60 }
  0xfe   : > { %683 = vst.msk [vmem:[%s1081_s12 + $0x40] sm:$0xff] %vm674_vm2, %v650_v63  ;;  %699 = vst.msk [vmem:[%s1081_s12 + $0xc0] sm:$0xff] %vm674_vm2, %v666_v0  ;;  %v620_v5 = vadd.f32 %v1068_v41, %v581_v1  ;;  %v636_v6 = vadd.f32 %v1068_v41, %v597_v2  ;;  %v876_v7 = vpop.f32.mrb[12].mxu0  ;;  %v900_v8 = vpop.f32.mrb[12].mxu1 }
  0xff   : > { %v653_v9 = vmax.f32 %v621_v3, 0.0  ;;  %v669_v10 = vmax.f32 %v637_v4, 0.0  ;;  %v584_v11 = vmul.f32 %v876_v7, %v1063_v39  ;;  %v600_v12 = vmul.f32 %v900_v8, %v1063_v39  ;;  %v465_v13 = vpop.f32.mrb[13].mxu0  ;;  %v545_v14 = vpop.f32.mrb[13].mxu1 }
 0x100   : > { %v652_v15 = vmax.f32 %v620_v5, 0.0  ;;  %v668_v16 = vmax.f32 %v636_v6, 0.0  ;;  %v583_v17 = vmul.f32 %v1063_v39, %v465_v13  ;;  %v599_v18 = vmul.f32 %v1063_v39, %v545_v14 }
 0x101   : > { %686 = vst.msk [vmem:[%s1081_s12 + $0x58] sm:$0xff] %vm674_vm2, %v653_v9  ;;  %702 = vst.msk [vmem:[%s1081_s12 + $0xd8] sm:$0xff] %vm674_vm2, %v669_v10  ;;  %v623_v19 = vadd.f32 %v1068_v41, %v584_v11  ;;  %v639_v20 = vadd.f32 %v1068_v41, %v600_v12 }
 0x102   : > { %685 = vst.msk [vmem:[%s1081_s12 + $0x50] sm:$0xff] %vm674_vm2, %v652_v15  ;;  %701 = vst.msk [vmem:[%s1081_s12 + $0xd0] sm:$0xff] %vm674_vm2, %v668_v16  ;;  %v622_v21 = vadd.f32 %v1068_v41, %v583_v17  ;;  %v638_v22 = vadd.f32 %v1068_v41, %v599_v18  ;;  %v879_v23 = vpop.f32.mrb[14].mxu0  ;;  %v903_v24 = vpop.f32.mrb[14].mxu1 }
 0x103   : > { %v655_v25 = vmax.f32 %v623_v19, 0.0  ;;  %v671_v26 = vmax.f32 %v639_v20, 0.0  ;;  %v586_v27 = vmul.f32 %v879_v23, %v1063_v39  ;;  %v602_v28 = vmul.f32 %v903_v24, %v1063_v39  ;;  %v475_v29 = vpop.f32.mrb[15].mxu0  ;;  %v555_v30 = vpop.f32.mrb[15].mxu1 }
 0x104   : > { %v654_v31 = vmax.f32 %v622_v21, 0.0  ;;  %v670_v32 = vmax.f32 %v638_v22, 0.0  ;;  %v585_v33 = vmul.f32 %v1063_v39, %v475_v29  ;;  %v601_v34 = vmul.f32 %v1063_v39, %v555_v30 }
 0x105   : > { %688 = vst.msk [vmem:[%s1081_s12 + $0x68] sm:$0xff] %vm674_vm2, %v655_v25  ;;  %704 = vst.msk [vmem:[%s1081_s12 + $0xe8] sm:$0xff] %vm674_vm2, %v671_v26  ;;  %v625_v35 = vadd.f32 %v1068_v41, %v586_v27  ;;  %v641_v36 = vadd.f32 %v1068_v41, %v602_v28 }
 0x106   : > { %687 = vst.msk [vmem:[%s1081_s12 + $0x60] sm:$0xff] %vm674_vm2, %v654_v31  ;;  %703 = vst.msk [vmem:[%s1081_s12 + $0xe0] sm:$0xff] %vm674_vm2, %v670_v32  ;;  %v624_v37 = vadd.f32 %v1068_v41, %v585_v33  ;;  %v640_v38 = vadd.f32 %v1068_v41, %v601_v34 }
 0x107   : > { %v657_v40 = vmax.f32 %v625_v35, 0.0  ;;  %v673_v42 = vmax.f32 %v641_v36, 0.0 }
 0x108   : > { %v656_v39 = vmax.f32 %v624_v37, 0.0  ;;  %v672_v43 = vmax.f32 %v640_v38, 0.0 }
 0x109   : > { %690 = vst.msk [vmem:[%s1081_s12 + $0x78] sm:$0xff] %vm674_vm2, %v657_v40  ;;  %706 = vst.msk [vmem:[%s1081_s12 + $0xf8] sm:$0xff] %vm674_vm2, %v673_v42 }
 0x10a   : > { %689 = vst.msk [vmem:[%s1081_s12 + $0x70] sm:$0xff] %vm674_vm2, %v656_v39  ;;  %705 = vst.msk [vmem:[%s1081_s12 + $0xf0] sm:$0xff] %vm674_vm2, %v672_v43 }
 0x10b PF: > { %s14_s15 = sadd.s32 1, %s932_s15  }
 0x10c   : > { %p11_p4 = scmp.ge.s32.totalorder %s14_s15, 4  }
 0x10e   :  { %13 = sbr.rel (!%p11_p4) target bundleno = 1 (0x1), region = 66 }

</bundles_post_ra>
